<compile_context>
chip_gen: v5e
topology: v5e:2x2
jax: 0.10.0
libtpu: 0.0.40
codegen_flags: <defaults>
</compile_context>

<pallas_src>
import functools

import jax
import jax.numpy as jnp
from jax.experimental import pallas as pl
from jax.experimental.pallas import tpu as pltpu


_LANE_COLS = 1024            # lane-dense width: 8 f32 vregs per slab row
_MAX_BLOCK_ROWS = 1024       # 1024 x 1024 f32 tile = 4 MiB; in+out double-buffered = 16 MiB
_VMEM_LIMIT_BYTES = 32 * 1024 * 1024  # safe on every generation (v5e default is 16 MiB)
_MIN_PALLAS_ELEMENTS = 1024  # below this the fused XLA affine wins on launch overhead


def _affine_kernel(p_ref, x_ref, o_ref):
    # p_ref: (1, 2) f32 in SMEM holding [w, b].
    # x_ref / o_ref: (block_rows, 1024) VMEM tiles in the input's native dtype.
    w = p_ref[0, 0]
    b = p_ref[0, 1]
    xv = x_ref[...].astype(jnp.float32)            # no-op for f32 inputs
    o_ref[...] = (xv * w + b).astype(o_ref.dtype)  # cast back on store


@functools.partial(jax.jit, static_argnames=("min_pallas_elements",))
def linear_1x1(x, weight, bias, *, min_pallas_elements=_MIN_PALLAS_ELEMENTS):
    """y = x @ weight.T + bias for weight (1,1), bias (1,); x is (N, 1)."""
    assert x.ndim == 2 and x.shape[-1] == 1
    n = x.shape[0]
    dtype = x.dtype

    w = weight.reshape(()).astype(jnp.float32)
    b = bias.reshape(()).astype(jnp.float32)

    # Tiny batch: per-call Pallas overhead dominates; let XLA fuse the affine.
    if n < min_pallas_elements:
        return (x.astype(jnp.float32) * w + b).astype(dtype)

    # ---- Lane-dense re-layout, kept in native dtype ----
    rows = pl.cdiv(n, _LANE_COLS)
    padded_n = rows * _LANE_COLS
    xf = x.reshape(-1)                      # free view of (N, 1)
    aligned = padded_n == n
    if not aligned:
        # TODO(synk): pad/slice costs one extra HBM round trip; hit only when N % 1024 != 0.
        xf = jnp.pad(xf, (0, padded_n - n))
    x2 = xf.reshape(rows, _LANE_COLS)       # free reshape when aligned (no copy)

    # Block sizing: whole array if it fits one tile (always a legal block shape),
    # otherwise 1024-row tiles; the grid's partial final block is masked by Pallas.
    block_rows = rows if rows <= _MAX_BLOCK_ROWS else _MAX_BLOCK_ROWS
    num_blocks = pl.cdiv(rows, block_rows)

    params = jnp.stack([w, b]).reshape(1, 2)

    # v7x (2 TensorCores): plain "parallel" does not reliably shard the grid across
    # cores -- request CORE_PARALLEL when there is more than one tile to hand out.
    core_parallel = getattr(pltpu, "CORE_PARALLEL", "parallel")
    is_v7 = "v7" in jax.devices()[0].device_kind.lower()
    dim_sem = (core_parallel,) if (is_v7 and num_blocks >= 2) else ("parallel",)

    itemsize = jnp.dtype(dtype).itemsize
    cost = pl.CostEstimate(
        flops=2 * padded_n,
        transcendentals=0,
        bytes_accessed=2 * padded_n * itemsize + 8,
    )

    y2 = pl.pallas_call(
        _affine_kernel,
        out_shape=jax.ShapeDtypeStruct((rows, _LANE_COLS), dtype),
        grid_spec=pltpu.PrefetchScalarGridSpec(
            num_scalar_prefetch=0,
            grid=(num_blocks,),
            in_specs=[
                pl.BlockSpec(memory_space=pltpu.SMEM),                      # [w, b] scalars
                pl.BlockSpec((block_rows, _LANE_COLS), lambda i: (i, 0)),   # x tile
            ],
            out_specs=pl.BlockSpec((block_rows, _LANE_COLS), lambda i: (i, 0)),
        ),
        compiler_params=pltpu.CompilerParams(
            dimension_semantics=dim_sem,
            vmem_limit_bytes=_VMEM_LIMIT_BYTES,
        ),
        cost_estimate=cost,
    )(params, x2)

    if aligned:
        return y2.reshape(n, 1)             # free reshape back, zero extra traffic
    return y2.reshape(-1)[:n].reshape(n, 1)


if __name__ == "__main__":
    key = jax.random.PRNGKey(0)
    k_x, k_w, k_b = jax.random.split(key, 3)

    # nn.Linear(1, 1)-style parameters (uniform(-1, 1) for fan_in=1).
    weight = jax.random.uniform(k_w, (1, 1), minval=-1.0, maxval=1.0, dtype=jnp.float32)
    bias = jax.random.uniform(k_b, (1,), minval=-1.0, maxval=1.0, dtype=jnp.float32)

    # 1) N % 1024 == 0: fully zero-copy Pallas path (1 HBM read + 1 HBM write).
    n_aligned = 2048
    x = jax.random.normal(k_x, (n_aligned, 1), dtype=jnp.float32)
    y = linear_1x1(x, weight, bias)
    jax.block_until_ready(y)
    y_ref = x @ weight.T + bias
    assert y.shape == (n_aligned, 1)
    assert jnp.allclose(y, y_ref, atol=1e-5), "mismatch vs reference (aligned Pallas path)"

    # 2) Unaligned N: padded Pallas path (still correct; pad rows compute w*0+b and are sliced off).
    n_odd = 1500
    x_odd = jax.random.normal(k_x, (n_odd, 1), dtype=jnp.float32)
    y_odd = linear_1x1(x_odd, weight, bias)
    jax.block_until_ready(y_odd)
    assert jnp.allclose(y_odd, x_odd @ weight.T + bias, atol=1e-5), "mismatch (padded Pallas path)"

    # 3) Tiny batch: XLA fallback path must match too.
    x_small = jax.random.normal(k_x, (8, 1), dtype=jnp.float32)
    y_small = linear_1x1(x_small, weight, bias)
    jax.block_until_ready(y_small)
    assert jnp.allclose(y_small, x_small @ weight.T + bias, atol=1e-6), "mismatch (small path)"

    print("KERNEL_OK")
</pallas_src>

<mosaic_0001>
module attributes {stable_mosaic.version = 11 : i64} {
  func.func @_affine_kernel(%arg0: i32, %arg1: memref<1x2xf32, #tpu.memory_space<smem>>, %arg2: memref<2x1024xf32, #tpu.memory_space<vmem>>, %arg3: memref<2x1024xf32, #tpu.memory_space<vmem>>) attributes {dimension_semantics = [#tpu.dimension_semantics<parallel>], iteration_bounds = array<i64: 1>, scalar_prefetch = 0 : i64, scratch_operands = 0 : i64, tpu.core_type = #tpu.core_type<tc>, window_params = [{transform_indices = @transform_0, window_bounds = array<i64: 1, 2>}, {transform_indices = @transform_1, window_bounds = array<i64: 2, 1024>}, {transform_indices = @transform_2, window_bounds = array<i64: 2, 1024>}]} {
    %c0 = arith.constant 0 : index
    %c0_0 = arith.constant 0 : index
    %0 = memref.load %arg1[%c0, %c0_0] : memref<1x2xf32, #tpu.memory_space<smem>>
    %c0_1 = arith.constant 0 : index
    %c1 = arith.constant 1 : index
    %1 = memref.load %arg1[%c0_1, %c1] : memref<1x2xf32, #tpu.memory_space<smem>>
    %c0_2 = arith.constant 0 : index
    %c0_3 = arith.constant 0 : index
    %2 = vector.load %arg2[%c0_2, %c0_3] : memref<2x1024xf32, #tpu.memory_space<vmem>>, vector<2x1024xf32>
    %3 = vector.broadcast %0 : f32 to vector<2x1024xf32>
    %4 = arith.mulf %2, %3 : vector<2x1024xf32>
    %5 = vector.broadcast %1 : f32 to vector<2x1024xf32>
    %6 = arith.addf %4, %5 : vector<2x1024xf32>
    %c0_4 = arith.constant 0 : index
    %c0_5 = arith.constant 0 : index
    %7 = vector.load %arg3[%c0_4, %c0_5] : memref<2x1024xf32, #tpu.memory_space<vmem>>, vector<2x1024xf32>
    tpu.vector_store %arg3[%c0_4, %c0_5], %6 {strides = array<i32>} : memref<2x1024xf32, #tpu.memory_space<vmem>>, vector<2x1024xf32>,
    return
  }
  func.func @transform_0(%arg0: i32) -> (i32, i32) {
    %c0_i32 = arith.constant 0 : i32
    %c0_i32_0 = arith.constant 0 : i32
    %c0_i32_1 = arith.constant 0 : i32
    return %c0_i32, %c0_i32_0 : i32, i32
  }
  func.func @transform_1(%arg0: i32) -> (i32, i32) {
    %c0_i32 = arith.constant 0 : i32
    %c0_i32_0 = arith.constant 0 : i32
    return %arg0, %c0_i32 : i32, i32
  }
  func.func @transform_2(%arg0: i32) -> (i32, i32) {
    %c0_i32 = arith.constant 0 : i32
    %c0_i32_0 = arith.constant 0 : i32
    return %arg0, %c0_i32 : i32, i32
  }
}

</mosaic_0001>

<bundles_post_ra>
// kernel: linear_1x1.1
= control target key start
LH: loop header
LB: loop body
LE: loop exit
PB: predicated region body
PF: predicated region fallthrough
CT: control target
= control target key end

     0   :  { %7 = vsyncpa [#allocation3], 0  ;;  %s57_s12 = smov [#allocation2]   ;;  %s88_s0 = inlined_call_operand.vmem [shape: f32[1,2], index: 0, kind: input, shape index: {}]   ;;  %s89_s1 = inlined_call_operand.vmem [shape: f32[2,1024], index: 1, kind: input, shape index: {}]   ;;  %s90_s2 = inlined_call_operand.vmem [shape: f32[2,1024], index: 2, kind: output, shape index: {}]  }
   0x1   :  { %s13_s11 = sshll.u32 %s88_s0, 4  ;;  %s14_s11 = int_to_ptr.vmem [resolvable:$true] %s13_s11 }
   0x2   :  { %16 = dma.vmem_to_smem %s14_s11, 16, %s57_s12, [#allocation3]  }
   0x3   :  { %55 = dma.done.wait [#allocation3], 16  }
   0x4   :  { %56 = vsyncadd [#allocation3], 4294967280 }
   0x5   :  { %23 = sfence }
   0x6   :  { %s24_s13 = sld [smem:[#allocation2]]  ;;  %v26_v0 = vld [vmem:[%s89_s1] sm:$0xff]  ;;  %v27_v1 = vld [vmem:[%s89_s1 + $0x8] sm:$0xff] }
   0x7   :  { %s41_s14 = sld [smem:[#allocation2 + $0x1]] }
   0xc   :  { %v28_v2 = vstv %s24_s13 }
   0xd   :  { %v29_v3 = vmul.f32 %v28_v2, %v26_v0  ;;  %v31_v4 = vstv %s41_s14  ;;  %v30_v5 = vmul.f32 %v28_v2, %v27_v1 }
   0xf   :  { %v32_v6 = vadd.f32 %v31_v4, %v29_v3  ;;  %v33_v7 = vadd.f32 %v31_v4, %v30_v5 }
  0x11   :  { %34 = vst [vmem:[%s90_s2] sm:$0xff] %v32_v6 }
  0x12   :  { %35 = vst [vmem:[%s90_s2 + $0x8] sm:$0xff] %v33_v7 }
  0x13   :  { %40 = vsyncpa [#allocation3], 1 }

</bundles_post_ra>
